<compile_context>
chip_gen: v7x
topology: tpu7x:2x2x1
jax: 0.10.0
libtpu: 0.0.40
codegen_flags: <defaults>
</compile_context>

<pallas_src>
import functools

import jax
import jax.numpy as jnp
from jax import lax
from jax.experimental import pallas as pl
from jax.experimental.pallas import tpu as pltpu


def _ls_ce_kernel(pred_ref, tgt_ref, out_ref, *,
                  smoothing: float, n_total: int, tile_rows: int):
    # pred_ref: (TN, C) logits tile, tgt_ref: (TN, 1) int32 labels,
    # out_ref: (1, 8, 128) f32 per-tile partial sum (broadcast, single vreg store).
    i = pl.program_id(0)

    x = pred_ref[...].astype(jnp.float32)          # (TN, C); HBM traffic stays in input dtype
    tn, c = x.shape
    confidence = jnp.float32(1.0 - smoothing)
    off_value = jnp.float32(smoothing / (c - 1))

    # ---- row-wise reductions only; no (TN, C) logp / true_dist temporaries ----
    m = jnp.max(x, axis=-1, keepdims=True)                                   # (TN, 1)
    lse = jnp.log(jnp.sum(jnp.exp(x - m), axis=-1, keepdims=True))           # (TN, 1)
    mlse = m + lse                                                           # log-normalizer

    # Fused smoothed-distribution reduction: true_dist row is off_value
    # everywhere and confidence at the target column; each row sums to 1, so
    #   loss_row = sum(true_dist * (mlse - x)) = mlse - sum(w * x)
    class_ids = lax.broadcasted_iota(jnp.int32, (tn, c), 1)
    w = jnp.where(class_ids == tgt_ref[...], confidence, off_value)          # (TN, C)
    weighted = jnp.sum(w * x, axis=-1, keepdims=True)                        # (TN, 1)
    per_row = mlse - weighted                                                # (TN, 1)
    # NOTE: out-of-range targets degrade to an all-off_value row (finite loss)
    # rather than faulting like torch.scatter_ would.

    # ---- mask padded rows of a partial last tile (static no-op when N % TN == 0).
    # The mask MUST stay a jnp.where applied *before* the reduction: the padded
    # rows hold undefined HBM/VMEM data and may be NaN/Inf; select-before-sum
    # keeps them out of the accumulated value.
    if n_total % tile_rows != 0:
        row_ids = i * tile_rows + lax.broadcasted_iota(jnp.int32, (tn, 1), 0)
        per_row = jnp.where(row_ids < n_total, per_row, jnp.float32(0.0))

    tile_sum = jnp.sum(per_row)
    out_ref[...] = jnp.full(out_ref.shape, tile_sum, dtype=jnp.float32)


def _choose_tile_rows(n: int, c: int, itemsize: int) -> int:
    # Native sublane tile for the logits dtype: 8 rows (f32), 16 (bf16), 32 (int8/fp8).
    sublane = max(8, 32 // max(1, itemsize))
    # Per-row VMEM cost of one pipeline buffer: the logits row plus the (tn, 1)
    # int32 target row, whose single lane pads out to 128 lanes (512 B/row).
    per_row_bytes = c * itemsize + 128 * 4
    # ~8 MiB per buffer; with double buffering that's ~16 MiB total, well inside
    # the explicit 48 MiB vmem_limit_bytes (v7x physical VMEM is 64 MiB / core).
    target_bytes = 8 * 1024 * 1024
    tn = (target_bytes // per_row_bytes) // sublane * sublane
    tn = int(max(sublane, tn))
    if n <= tn:
        return int(n)   # single block covering the whole (small) batch
    return tn


def label_smoothing_cross_entropy(pred, target, smoothing: float = 0.1,
                                  tile_rows: int | None = None):
    """pred: (N, C) float logits, target: (N,) int labels -> scalar f32 loss."""
    assert 0.0 <= smoothing < 1.0
    n, c = pred.shape
    assert c > 1, "need at least 2 classes (smoothing / (C - 1))"
    target_2d = target.reshape(n, 1).astype(jnp.int32)

    itemsize = jnp.dtype(pred.dtype).itemsize
    tn = int(tile_rows if tile_rows is not None else _choose_tile_rows(n, c, itemsize))
    grid_n = pl.cdiv(n, tn)

    cost = pl.CostEstimate(
        flops=6 * n * c,
        transcendentals=n * c,
        bytes_accessed=n * c * itemsize + n * 4 + grid_n * 8 * 128 * 4,
    )

    partials = pl.pallas_call(
        functools.partial(_ls_ce_kernel, smoothing=float(smoothing),
                          n_total=int(n), tile_rows=tn),
        out_shape=jax.ShapeDtypeStruct((grid_n, 8, 128), jnp.float32),
        grid=(grid_n,),
        in_specs=[
            pl.BlockSpec((tn, c), lambda i: (i, 0)),   # logits tile (VMEM, double-buffered)
            pl.BlockSpec((tn, 1), lambda i: (i, 0)),   # targets tile (lane-padded in VMEM)
        ],
        out_specs=pl.BlockSpec((1, 8, 128), lambda i: (i, 0, 0)),  # per-tile partial sum
        compiler_params=pltpu.CompilerParams(
            dimension_semantics=("parallel",),   # independent tiles -> megacore split on v7x
            vmem_limit_bytes=48 * 1024 * 1024,
        ),
        cost_estimate=cost,
    )(pred, target_2d)

    # Tiny G-element reduction + mean normalization in the wrapper.
    return jnp.sum(partials[:, 0, 0]) * jnp.float32(1.0 / n)


def _reference(pred, target, smoothing):
    n, c = pred.shape
    logp = jax.nn.log_softmax(pred.astype(jnp.float32), axis=-1)
    off = smoothing / (c - 1)
    true_dist = jnp.full((n, c), off, dtype=jnp.float32)
    true_dist = true_dist.at[jnp.arange(n), target].set(1.0 - smoothing)
    return jnp.mean(jnp.sum(-true_dist * logp, axis=-1))


if __name__ == "__main__":
    key = jax.random.PRNGKey(0)
    k_pred, k_tgt, k_pred2, k_tgt2 = jax.random.split(key, 4)

    # Small shapes consistent with (batch, num_classes) logits.
    N, C = 8, 32
    pred = jax.random.normal(k_pred, (N, C), dtype=jnp.float32)
    target = jax.random.randint(k_tgt, (N,), 0, C, dtype=jnp.int32)

    loss = label_smoothing_cross_entropy(pred, target, smoothing=0.1)
    jax.block_until_ready(loss)
    ref = _reference(pred, target, 0.1)
    assert jnp.allclose(loss, ref, atol=1e-5, rtol=1e-5), (loss, ref)

    # Exercise the multi-tile "parallel" path with a partial last tile:
    # N not a multiple of the tile, grid of 3 per-tile partial sums.
    N2, C2 = 20, 32
    pred2 = jax.random.normal(k_pred2, (N2, C2), dtype=jnp.float32)
    target2 = jax.random.randint(k_tgt2, (N2,), 0, C2, dtype=jnp.int32)
    loss2 = label_smoothing_cross_entropy(pred2, target2, smoothing=0.1, tile_rows=8)
    jax.block_until_ready(loss2)
    ref2 = _reference(pred2, target2, 0.1)
    assert jnp.allclose(loss2, ref2, atol=1e-5, rtol=1e-5), (loss2, ref2)

    print("KERNEL_OK")
</pallas_src>

<mosaic_0001>
module attributes {stable_mosaic.version = 11 : i64} {
  func.func @_ls_ce_kernel(%arg0: i32, %arg1: memref<8x32xf32, #tpu.memory_space<vmem>>, %arg2: memref<8x1xi32, #tpu.memory_space<vmem>>, %arg3: memref<1x8x128xf32, #tpu.memory_space<vmem>>) attributes {dimension_semantics = [#tpu.dimension_semantics<parallel>], iteration_bounds = array<i64: 1>, scalar_prefetch = 0 : i64, scratch_operands = 0 : i64, tpu.core_type = #tpu.core_type<tc>, window_params = [{transform_indices = @transform_0, window_bounds = array<i64: 8, 32>}, {transform_indices = @transform_1, window_bounds = array<i64: 8, 1>}, {transform_indices = @transform_2, window_bounds = array<i64: 1, 8, 128>}]} {
    %c0 = arith.constant 0 : index
    %c0_0 = arith.constant 0 : index
    %0 = vector.load %arg1[%c0, %c0_0] : memref<8x32xf32, #tpu.memory_space<vmem>>, vector<8x32xf32>
    %cst = arith.constant dense<0xFF800000> : vector<8xf32>
    %1 = vector.multi_reduction <maximumf>, %0, %cst [1] : vector<8x32xf32> to vector<8xf32>
    %2 = vector.shape_cast %1 : vector<8xf32> to vector<8x1xf32>
    %3 = vector.broadcast %2 : vector<8x1xf32> to vector<8x32xf32>
    %4 = arith.subf %0, %3 : vector<8x32xf32>
    %5 = math.exp %4 : vector<8x32xf32>
    %cst_1 = arith.constant dense<0.000000e+00> : vector<8xf32>
    %6 = vector.multi_reduction <add>, %5, %cst_1 [1] : vector<8x32xf32> to vector<8xf32>
    %7 = vector.shape_cast %6 : vector<8xf32> to vector<8x1xf32>
    %8 = math.log %7 : vector<8x1xf32>
    %9 = arith.addf %2, %8 : vector<8x1xf32>
    %10 = tpu.iota {dimensions = array<i32: 1>} : vector<8x32xi32>
    %c0_2 = arith.constant 0 : index
    %c0_3 = arith.constant 0 : index
    %11 = vector.load %arg2[%c0_2, %c0_3] : memref<8x1xi32, #tpu.memory_space<vmem>>, vector<8x1xi32>
    %12 = vector.broadcast %11 : vector<8x1xi32> to vector<8x32xi32>
    %13 = arith.cmpi eq, %10, %12 : vector<8x32xi32>
    %cst_4 = arith.constant 0.899999976 : f32
    %cst_5 = arith.constant 0.0032258064 : f32
    %14 = vector.broadcast %cst_4 : f32 to vector<8x32xf32>
    %15 = vector.broadcast %cst_5 : f32 to vector<8x32xf32>
    %16 = arith.select %13, %14, %15 : vector<8x32xi1>, vector<8x32xf32>
    %17 = arith.mulf %16, %0 : vector<8x32xf32>
    %cst_6 = arith.constant dense<0.000000e+00> : vector<8xf32>
    %18 = vector.multi_reduction <add>, %17, %cst_6 [1] : vector<8x32xf32> to vector<8xf32>
    %19 = vector.shape_cast %18 : vector<8xf32> to vector<8x1xf32>
    %20 = arith.subf %9, %19 : vector<8x1xf32>
    %21 = vector.shape_cast %20 : vector<8x1xf32> to vector<1x8x1xf32>
    %cst_7 = arith.constant dense<0.000000e+00> : vector<1xf32>
    %22 = vector.multi_reduction <add>, %21, %cst_7 [1, 2] : vector<1x8x1xf32> to vector<1xf32>
    %23 = vector.shape_cast %22 : vector<1xf32> to vector<1x1x1xf32>
    %24 = vector.extract %23[0, 0, 0] : f32 from vector<1x1x1xf32>
    %25 = vector.broadcast %24 : f32 to vector<1x8x128xf32>
    %c0_8 = arith.constant 0 : index
    %c0_9 = arith.constant 0 : index
    %c0_10 = arith.constant 0 : index
    %26 = vector.load %arg3[%c0_8, %c0_9, %c0_10] : memref<1x8x128xf32, #tpu.memory_space<vmem>>, vector<1x8x128xf32>
    tpu.vector_store %arg3[%c0_8, %c0_9, %c0_10], %25 {strides = array<i32>} : memref<1x8x128xf32, #tpu.memory_space<vmem>>, vector<1x8x128xf32>,
    return
  }
  func.func @transform_0(%arg0: i32) -> (i32, i32) {
    %c0_i32 = arith.constant 0 : i32
    %c0_i32_0 = arith.constant 0 : i32
    return %arg0, %c0_i32 : i32, i32
  }
  func.func @transform_1(%arg0: i32) -> (i32, i32) {
    %c0_i32 = arith.constant 0 : i32
    %c0_i32_0 = arith.constant 0 : i32
    return %arg0, %c0_i32 : i32, i32
  }
  func.func @transform_2(%arg0: i32) -> (i32, i32, i32) {
    %c0_i32 = arith.constant 0 : i32
    %c0_i32_0 = arith.constant 0 : i32
    %c0_i32_1 = arith.constant 0 : i32
    return %arg0, %c0_i32, %c0_i32_0 : i32, i32, i32
  }
}

</mosaic_0001>

<bundles_post_ra>
// kernel: tpu_custom_call.1
= control target key start
LH: loop header
LB: loop body
LE: loop exit
PB: predicated region body
PF: predicated region fallthrough
CT: control target
= control target key end

     0   :  { %vm13_vm0 = vcmask 261120   ;;  %s139_s0 = inlined_call_operand.vmem [shape: f32[8,32], index: 0, kind: input, shape index: {}]   ;;  %s140_s1 = inlined_call_operand.vmem [shape: s32[8,1], index: 1, kind: input, shape index: {}]   ;;  %s141_s2 = inlined_call_operand.hbm [shape: f32[1,8,128], index: 2, kind: output, shape index: {}]  }
   0x1   :  { %v12_v0 = vld [vmem:[%s139_s0] sm:$0xff] }
   0x2   :  { %7 = vsyncpa [#allocation3], 0  ;;  %v14_v1 = vsel %vm13_vm0, %v12_v0, -inf  ;;  %v100_v2 = vmov 0   ;;  %v28_v3 = vld [vmem:[%s140_s1] sm:$0xff]  ;;  %v26_v6 = vlaneseq  ;;  %vm39_vm2 = vcmask 7168  }
   0x3   :  { %71 = vset.pattern.permute.xlu0 %v100_v2  ;;  %v101_v10 = vmov 0.0032258064   ;;  %s102_s0 = smov [#allocation2]  }
   0x4   :  { %15 = vmax.xlane.f32.xlu0 %v14_v1  ;;  %v27_v8 = vand.u32 127, %v26_v6  ;;  %s58_s1 = sshll.u32 %s102_s0, 4  ;;  %s59_s1 = int_to_ptr.vmem [resolvable:$true] %s58_s1 }
   0x5   :  { %s76_s14 = scalar_lea.vmem %s59_s1, 128  ;;  %p81_p1 = scmp.lt.s32.totalorder %s59_s1, %s59_s1 }
   0x6   :  { %p77_p0 = scmp.ne.s32.totalorder %s59_s1, %s76_s14  ;;  %p82_p2 = scmp.lt.s32.totalorder %s76_s14, %s76_s14 }
   0x8   :  { %p83_p3 = por %p82_p2, %p81_p1 }
   0xa   :  { %p84_p4 = pnand %p83_p3, %p77_p0 }
  0x1a   :  { %30 = vperm.xlu0 %71, %v28_v3  }
  0x91   :  { %v16_v4 = vpop.xlane.xlu0 %15 }
  0x92   :  { %v17_v5 = vsub.f32 %v12_v0, %v16_v4 }
  0x94   :  { %v18_v7 = vmul.f32 1.442695, %v17_v5 }
  0x96   :  { %72 = vpow2.f32 %v18_v7 }
  0x99   :  { %v31_v9 = vpop.permute.xlu0 %30 }
  0x9a   :  { %vm32_vm1 = vcmp.eq.s32.totalorder %v27_v8, %v31_v9 }
  0x9b   :  { %v33_v11 = vsel %vm32_vm1, 0.9, %v101_v10 }
  0x9c   :  { %v34_v12 = vmul.f32 %v33_v11, %v12_v0 }
  0x9e   :  { %v35_v15 = vsel %vm13_vm0, %v34_v12, 0.0 }
  0xa0   :  { %v73_v13 = vpop.eup %72 }
  0xa1   :  { %v20_v14 = vsel %vm13_vm0, %v73_v13, 0.0 }
  0xa2   :  { %21 = vadd.xlane.f32.xlu1 %v20_v14 }
  0xa6   :  { %36 = vadd.xlane.f32.xlu1 %v35_v15 }
 0x12f   :  { %v22_v16 = vpop.xlane.xlu1 %21 }
 0x130   :  { %74 = vlog2.f32 %v22_v16 }
 0x133   :  { %v37_v19 = vpop.xlane.xlu1 %36 }
 0x13a   :  { %v75_v17 = vpop.eup %74 }
 0x13b   :  { %v24_v18 = vmul.f32 0.6931472, %v75_v17 }
 0x13d   :  { %v25_v20 = vadd.f32 %v24_v18, %v16_v4 }
 0x13f   :  { %v38_v21 = vsub.f32 %v25_v20, %v37_v19 }
 0x141   :  { %v40_v22 = vsel %vm39_vm2, %v38_v21, 0.0 }
 0x142   :  { %41 = vadd.xlane.f32.xlu1 %v40_v22 }
 0x1cf   :  { %v42_v23 = vpop.xlane.xlu1 %41 }
 0x1d0   :  { %v43_v24 = vrot.slane %v42_v23, 4 }
 0x1d2   :  { %v44_v25 = vadd.f32 %v43_v24, %v42_v23 }
 0x1d4   :  { %v45_v26 = vrot.slane %v44_v25, 2 }
 0x1d6   :  { %v46_v27 = vadd.f32 %v45_v26, %v44_v25 }
 0x1d8   :  { %v47_v28 = vrot.slane %v46_v27, 1 }
 0x1da   :  { %v48_v29 = vadd.f32 %v47_v28, %v46_v27 }
 0x1dc   :  { %66 = vpush %v48_v29 }
 0x20d   :  { %s67_s13 = spop %66 }
 0x20e   :  { %v50_v30 = vstv %s67_s13 }
 0x20f   :  { %51 = vst [vmem:[#allocation2] sm:$0xff] %v50_v30 }
 0x210   :  { %87 = shalt.err (!%p84_p4)
}
 0x211   :  { %s88_s17 = scalar_lea.hbm %s141_s2, 128 }
 0x212   :  { %p89_p5 = scmp.ne.s32.totalorder %s141_s2, %s88_s17  ;;  %p92_p6 = scmp.lt.u32.totalorder %s88_s17, %s141_s2 }
 0x214   :  { %p94_p7 = pnand %p92_p6, %p89_p5 }
 0x216   :  { %97 = shalt.err (!%p94_p7)
}
 0x217   :  { %61 = dma.vmem_to_hbm [thread:$0]  %s59_s1, 128, %s141_s2, [#allocation3]  }
 0x218   :  { %98 = dma.done.wait [#allocation3], 128  }
 0x219   :  { %99 = vsyncadd [#allocation3], 4294967168 }
 0x21a   :  { %65 = vsyncpa [#allocation3], 1 }

</bundles_post_ra>
